<compile_context>
chip_gen: v5e
topology: v5e:2x2
jax: 0.10.0
libtpu: 0.0.40
codegen_flags: <defaults>
</compile_context>

<pallas_src>
import jax
import jax.numpy as jnp
from jax import lax
from jax.experimental import pallas as pl
from jax.experimental.pallas import tpu as pltpu


def _round_up(x, m):
    return ((x + m - 1) // m) * m


def _lm_head_kernel(x_ref, w_ref, o_ref):
    # x_ref: [tile_s, H] bf16, w_ref: [tile_v, H] bf16, o_ref: [tile_s, tile_v] f32
    # Contract directly over H (RHS in its native "transposed" [V, H] layout);
    # avoids a per-step XLU transpose of the weight tile.
    o_ref[...] = lax.dot_general(
        x_ref[...],
        w_ref[...],
        dimension_numbers=(((1,), (1,)), ((), ())),
        preferred_element_type=jnp.float32,
    )


def _choose_tiles(S, H, V, *, vmem_budget_bytes=40 << 20,
                  max_tile_v=2048, max_tile_s=256):
    """Pick (tile_s, tile_v) so double-buffered blocks fit a conservative
    VMEM budget (safe even on v7x's 64 MiB physical VMEM)."""
    tile_s = S if S <= max_tile_s else max_tile_s
    v_cap = min(max_tile_v, _round_up(V, 128))

    def fits(tv):
        need = (2 * tile_s * H * 2      # bf16 x blocks, double buffered
                + 2 * tv * H * 2        # bf16 weight blocks, double buffered
                + 2 * tile_s * tv * 4)  # f32 output blocks, double buffered
        return need <= vmem_budget_bytes

    tile_v = 128
    for cand in (2048, 1024, 512, 256, 128):   # multiples of 256 preferred (v6e MXU)
        if cand <= v_cap and fits(cand):
            tile_v = cand
            break
    return tile_s, tile_v


def lm_head(hidden_states, weight, *, tile_s=None, tile_v=None):
    """logits = hidden_states @ weight.T  (nn.Linear, bias=False).

    Streams operands as bf16, accumulates in f32 on the MXU, tiles the vocab
    (and, when large, the token) dimension.
    """
    S, H = hidden_states.shape
    V, H2 = weight.shape
    assert H == H2, "hidden dim mismatch"

    auto_s, auto_v = _choose_tiles(S, H, V)
    tile_s = auto_s if tile_s is None else tile_s
    tile_v = auto_v if tile_v is None else tile_v

    # bf16 streaming (no-op casts if the caller already stored bf16).
    x = hidden_states.astype(jnp.bfloat16)
    w = weight.astype(jnp.bfloat16)

    # Pad so every grid step sees a full, lane-dense block; slice back after.
    S_pad = _round_up(S, tile_s)
    V_pad = _round_up(V, tile_v)
    if S_pad != S:
        x = jnp.pad(x, ((0, S_pad - S), (0, 0)))
    if V_pad != V:
        w = jnp.pad(w, ((0, V_pad - V), (0, 0)))

    grid = (pl.cdiv(S_pad, tile_s), pl.cdiv(V_pad, tile_v))

    vmem_needed = (2 * tile_s * H * 2 + 2 * tile_v * H * 2
                   + 2 * tile_s * tile_v * 4)
    vmem_limit = int(min(max(vmem_needed + (4 << 20), 32 << 20), 64 << 20))

    cost = pl.CostEstimate(
        flops=2 * S_pad * H * V_pad,
        transcendentals=0,
        bytes_accessed=V_pad * H * 2 + S_pad * H * 2 + S_pad * V_pad * 4,
    )

    out = pl.pallas_call(
        _lm_head_kernel,
        out_shape=jax.ShapeDtypeStruct((S_pad, V_pad), jnp.float32),
        grid_spec=pltpu.PrefetchScalarGridSpec(
            num_scalar_prefetch=0,
            grid=grid,
            in_specs=[
                # hidden states: one token tile, reused across all vocab tiles
                pl.BlockSpec((tile_s, H), lambda i, j: (i, 0)),
                # weight: one vocab tile per grid step (bf16 stream)
                pl.BlockSpec((tile_v, H), lambda i, j: (j, 0)),
            ],
            out_specs=pl.BlockSpec((tile_s, tile_v), lambda i, j: (i, j)),
        ),
        compiler_params=pltpu.CompilerParams(
            dimension_semantics=("parallel", "parallel"),
            vmem_limit_bytes=vmem_limit,
        ),
        cost_estimate=cost,
    )(x, w)

    if S_pad != S or V_pad != V:
        out = out[:S, :V]
    return out


class LoraModule:
    """JAX/Pallas analogue of the PyTorch `LoraModule` export wrapper.

    Registers the projection weight (stored bf16 once, halving HBM stream
    bytes) and applies y = x @ W.T with the Pallas MXU kernel.
    """
    # TODO(synk): the PyTorch forward returns the raw buffer dict and .export()
    # does ONNX/MNN serialization; that is Python/export plumbing with no
    # tensor compute and has no Pallas equivalent.

    def __init__(self, weight):
        self.weight = jnp.asarray(weight).astype(jnp.bfloat16)  # [V, H]

    def __call__(self, hidden_states):
        return lm_head(hidden_states, self.weight)


if __name__ == "__main__":
    # Small shapes consistent with the forward (tokens x hidden -> tokens x vocab).
    # V is deliberately NOT a multiple of the chosen tile to exercise padding.
    S, H, V = 8, 128, 1920

    key = jax.random.PRNGKey(0)
    k_x, k_w = jax.random.split(key)
    hidden_states = jax.random.normal(k_x, (S, H), dtype=jnp.float32)
    weight = (jax.random.normal(k_w, (V, H), dtype=jnp.float32)
              * (1.0 / jnp.sqrt(H)))

    mod = LoraModule(weight)
    logits = mod(hidden_states)
    logits = jax.block_until_ready(logits)

    # Reference with the same bf16-streamed operands and f32 accumulation.
    x_bf = hidden_states.astype(jnp.bfloat16)
    w_bf = weight.astype(jnp.bfloat16)
    ref = jnp.dot(x_bf, w_bf.T, preferred_element_type=jnp.float32)

    assert logits.shape == (S, V)
    assert logits.dtype == jnp.float32
    assert jnp.allclose(logits, ref, atol=1e-3, rtol=1e-3), "mismatch vs reference"

    print("KERNEL_OK")
</pallas_src>

<mosaic_0001>
module attributes {stable_mosaic.version = 11 : i64} {
  func.func @_lm_head_kernel(%arg0: i32, %arg1: i32, %arg2: memref<8x128xbf16, #tpu.memory_space<vmem>>, %arg3: memref<1024x128xbf16, #tpu.memory_space<vmem>>, %arg4: memref<8x1024xf32, #tpu.memory_space<vmem>>) attributes {dimension_semantics = [#tpu.dimension_semantics<parallel>, #tpu.dimension_semantics<parallel>], iteration_bounds = array<i64: 1, 2>, scalar_prefetch = 0 : i64, scratch_operands = 0 : i64, tpu.core_type = #tpu.core_type<tc>, window_params = [{transform_indices = @transform_0, window_bounds = array<i64: 8, 128>}, {transform_indices = @transform_1, window_bounds = array<i64: 1024, 128>}, {transform_indices = @transform_2, window_bounds = array<i64: 8, 1024>}]} {
    %c0 = arith.constant 0 : index
    %c0_0 = arith.constant 0 : index
    %0 = vector.load %arg2[%c0, %c0_0] : memref<8x128xbf16, #tpu.memory_space<vmem>>, vector<8x128xbf16>
    %c0_1 = arith.constant 0 : index
    %c0_2 = arith.constant 0 : index
    %1 = vector.load %arg3[%c0_1, %c0_2] : memref<1024x128xbf16, #tpu.memory_space<vmem>>, vector<1024x128xbf16>
    %cst = arith.constant dense<0.000000e+00> : vector<8x1024xf32>
    %2 = tpu.matmul %0, %1, %cst {dimension_numbers = #tpu.dot_dimension_numbers<[1], [1], [0], [0], [0, 0, 1, 0], [], []>} : vector<8x128xbf16>, vector<1024x128xbf16>, vector<8x1024xf32> -> vector<8x1024xf32>
    %c0_3 = arith.constant 0 : index
    %c0_4 = arith.constant 0 : index
    %3 = vector.load %arg4[%c0_3, %c0_4] : memref<8x1024xf32, #tpu.memory_space<vmem>>, vector<8x1024xf32>
    tpu.vector_store %arg4[%c0_3, %c0_4], %2 {strides = array<i32>} : memref<8x1024xf32, #tpu.memory_space<vmem>>, vector<8x1024xf32>,
    return
  }
  func.func @transform_0(%arg0: i32, %arg1: i32) -> (i32, i32) {
    %c0_i32 = arith.constant 0 : i32
    %c0_i32_0 = arith.constant 0 : i32
    return %arg0, %c0_i32 : i32, i32
  }
  func.func @transform_1(%arg0: i32, %arg1: i32) -> (i32, i32) {
    %c0_i32 = arith.constant 0 : i32
    %c0_i32_0 = arith.constant 0 : i32
    return %arg1, %c0_i32 : i32, i32
  }
  func.func @transform_2(%arg0: i32, %arg1: i32) -> (i32, i32) {
    %c0_i32 = arith.constant 0 : i32
    return %arg0, %arg1 : i32, i32
  }
}

</mosaic_0001>

<bundles_post_ra>
// kernel: tpu_custom_call.1
= control target key start
LH: loop header
LB: loop body
LE: loop exit
PB: predicated region body
PF: predicated region fallthrough
CT: control target
= control target key end

     0   :  { %7 = vsyncpa [#allocation3], 0  ;;  %s1749_s0 = inlined_call_operand.hbm [shape: bf16[8,128], index: 0, kind: input, shape index: {}]   ;;  %s1750_s1 = inlined_call_operand.hbm [shape: bf16[2048,128], index: 1, kind: input, shape index: {}]   ;;  %s1751_s2 = inlined_call_operand.hbm [shape: f32[8,2048], index: 2, kind: output, shape index: {}]  }
   0x1   :  { %8 = vsyncpa [#allocation6], 0 }
   0x2   :  { %10 = vsyncpa [#allocation6 + $0x1], 0 }
   0x3   :  { %11 = vsyncpa [#allocation4], 0 }
   0x4   :  { %13 = vsyncpa [#allocation4 + $0x1], 0  ;;  %s1521_s9 = smov 0   ;;  %s1523_s10 = smov 0  }
   0x5   :  { %s1525_s11 = smov 0   ;;  %s1527_s12 = smov 0  }
   0x6   :  { %s1529_s13 = smov 0   ;;  %s1531_s14 = smov 0  }
   0x7 LB: > { %s941_s15 = sadd.s32 4294967295, %s1501_s14   ;;  %s942_s16 = sadd.s32 4294967294, %s1501_s14   ;;  %s1501_s14 = sphi %s1531_s14, %s19_s14   ;;  %s1497_s13 = sphi %s1529_s13, %s1763_s13   ;;  %s1493_s12 = sphi %s1527_s12, %s1762_s12   ;;  %s1489_s11 = sphi %s1525_s11, %s1761_s11   ;;  %s1485_s10 = sphi %s1523_s10, %s1760_s10   ;;  %s1481_s9 = sphi %s1521_s9, %s1759_s9  }
   0x8   : > { %s64_s17 = sadd.s32 1, %s1489_s11  ;;  %p71_p0 = scmp.ne.s32.totalorder %s1489_s11, %s1485_s10 }
   0x9   : > { %p72_p1 = scmp.eq.s32.totalorder %s1501_s14, 0  ;;  %p77_p2 = scmp.ne.s32.totalorder %s1485_s10, %s1481_s9 }
   0xa   : > { %p1559_p3 = scmp.eq.s32.totalorder %s941_s15, 0  ;;  %p103_p4 = scmp.eq.s32.totalorder %s941_s15, 1 }
   0xb   : > { %p1563_p5 = por %p72_p1, %p71_p0  ;;  %p109_p6 = scmp.eq.s32.totalorder %s942_s16, 1 }
   0xc   : > { %p1569_p7 = por %p1559_p3, %p77_p2  ;;  %p1573_p8 = por %p103_p4, %p71_p0 }
   0xd   : > { %p1577_p9 = por %p109_p6, %p77_p2  ;;  %p943_p10 = scmp.ge.s32.totalorder %s1501_s14, 1 }
   0xe   : > { %p116_p11 = scmp.lt.s32.totalorder %s1501_s14, 3  ;;  %s130_s25 = sshll.u32 %s1749_s0, 4  ;;  %s131_s25 = int_to_ptr.hbm [resolvable:$true] %s130_s25 }
   0xf   : > { %s1503_s27 = smov [#allocation2]   ;;  %p945_p13 = scmp.ge.s32.totalorder %s1501_s14, 2 }
  0x10   : > { %p1586_p12 = pnand %p943_p10, %p116_p11  ;;  %s132_s28 = sshll.u32 %s1503_s27, 4  ;;  %s133_s28 = int_to_ptr.vmem [resolvable:$true] %s132_s28 }
  0x11   : > { %p1301_p1 = scmp.lt.s32.totalorder %s1501_s14, 2  ;;  %s28_s30 = sadd.s32 1, %s1497_s13 }
  0x12   : > { %p1288_p0 = pneg %p1586_p12  ;;  %p29_p6 = scmp.ge.s32.totalorder %s28_s30, 2 }
  0x13   : > { %p1598_p4 = pnand %p1301_p1, %p1563_p5  ;;  %s143_s3 = sand.u32 1, %s1489_s11  }
  0x14   : > { %p1289_p2 = pnand %p1288_p0, %p1559_p3  ;;  %s1765_s30 = smov (%p29_p6, %s28_s30), 0 }
  0x15   : > { %s946_s4 = sshll.u32 %s143_s3, 9  ;;  %s61_s5 = ssub.s32 %s1497_s13, %s1765_s30 }
  0x16   : > { %1291 = dma.hbm_to_vmem [thread:$0]  (!%p1289_p2), %s131_s25, 64, %s133_s28, [#allocation3]  }
  0x17   : > { %p62_p10 = scmp.eq.s32.totalorder %s61_s5, 0  ;;  %s1214_s6 = sshll.u32 %s1497_s13, 9 }
  0x18   : > { %s152_s15 = scalar_lea.hbm %s1750_s1, %s1214_s6  ;;  %s147_s16 = scalar_lea.vmem [#allocation5], %s946_s4 }
  0x19   : > { %s155_s19 = sshll.u32 %s147_s16, 4  ;;  %s153_s24 = sshll.u32 %s152_s15, 4  ;;  %s156_s19 = int_to_ptr.vmem [resolvable:$true] %s155_s19  ;;  %s154_s24 = int_to_ptr.hbm [resolvable:$true] %s153_s24 }
  0x1a   : > { %s1615_s23 = scalar_select %p62_p10, %s1489_s11, %s64_s17  }
  0x1b   : > { %s144_s25 = scalar_lea.sflag [#allocation6], %s143_s3  ;;  %s1504_s27 = smov 64  }
  0x1c   : > { %s1505_s28 = smov 4   ;;  %167 = sbr.rel (%p1586_p12) target bundleno = 309 (0x135), region = 28 }
  0x1d   : > { %1295 = dma.hbm_to_vmem [thread:$0]  (!%p1598_p4), %s154_s24, 8192, %s156_s19, %s144_s25, %s1504_s27, %s1504_s27, %s1505_s28  }
  0x21   : > { %1468 = dma.done.wait (%p1559_p3), [#allocation3], 64  }
  0x22   : > { %1470 = vsyncadd (%p1559_p3), [#allocation3], 4294967232  ;;  %s1626_s17 = sand.u32 1, %s1485_s10  }
  0x23   : > { %s951_s3 = sshll.u32 %s1626_s17, 9  ;;  %s175_s4 = scalar_lea.sflag [#allocation6], %s1626_s17 }
  0x24   : > { %s1630_s5 = scalar_lea.vmem [#allocation5], %s951_s3 }
  0x25   : > { %1472 = dma.done.wait (%p1569_p7), %s175_s4, 8192  }
  0x26   : > { %1474 = vsyncadd (%p1569_p7), %s175_s4, 4294959104  ;;  %v1222_v0 = vld [vmem:[%s1630_s5 + $0x38] sm:$0xff]  ;;  %v1221_v4 = vld [vmem:[%s1630_s5 + $0x30] sm:$0xff]  ;;  %s952_s18 = sshll.u32 %s1626_s17, 6  ;;  %s1279_s26 = sshll.u32 %s1493_s12, 6 }
  0x27   : > { %v1230_v1 = vld [vmem:[%s1630_s5 + $0x78] sm:$0xff]  ;;  %715 = vmatpush.bf16.xpose.msra.mxu0 %v1222_v0  ;;  %v1229_v5 = vld [vmem:[%s1630_s5 + $0x70] sm:$0xff]  ;;  %v1220_v8 = vld [vmem:[%s1630_s5 + $0x28] sm:$0xff]  ;;  %s199_s20 = scalar_lea.vmem [#allocation7], %s952_s18  ;;  %s841_s7 = scalar_lea.hbm %s1751_s2, %s1279_s26 }
  0x28   : > { %v1238_v2 = vld [vmem:[%s1630_s5 + $0xb8] sm:$0xff]  ;;  %728 = vmatpush.bf16.xpose.msra.mxu1 %v1230_v1  ;;  %v1237_v6 = vld [vmem:[%s1630_s5 + $0xb0] sm:$0xff]  ;;  %v1228_v9 = vld [vmem:[%s1630_s5 + $0x68] sm:$0xff]  ;;  %s843_s8 = sshll.u32 %s199_s20, 4  ;;  %s845_s15 = sshll.u32 %s841_s7, 4  ;;  %s844_s8 = int_to_ptr.vmem [resolvable:$true] %s843_s8  ;;  %s846_s15 = int_to_ptr.hbm [resolvable:$true] %s845_s15 }
  0x29   : > { %v1246_v3 = vld [vmem:[%s1630_s5 + $0xf8] sm:$0xff]  ;;  %741 = vmatpush.bf16.xpose.msra.mxu2 %v1238_v2  ;;  %v1245_v7 = vld [vmem:[%s1630_s5 + $0xf0] sm:$0xff]  ;;  %v1236_v10 = vld [vmem:[%s1630_s5 + $0xa8] sm:$0xff]  ;;  %s828_s12 = scalar_lea.sflag [#allocation4], %s1626_s17  ;;  %s1429_s16 = sshra.s32 %s846_s15, 4  ;;  %s1430_s16 = int_to_ptr.hbm [resolvable:$true] %s1429_s16 }
  0x2a   : > { %754 = vmatpush.bf16.xpose.msra.mxu3 %v1246_v3  ;;  %v1244_v11 = vld [vmem:[%s1630_s5 + $0xe8] sm:$0xff]  ;;  %v1219_v12 = vld [vmem:[%s1630_s5 + $0x20] sm:$0xff]  ;;  %v1218_v16 = vld [vmem:[%s1630_s5 + $0x18] sm:$0xff]  ;;  %s1431_s19 = scalar_lea.hbm %s1430_s16, 64  ;;  %s1435_s27 = scalar_lea.hbm %s1751_s2, 128 }
  0x2b   : > { %v1227_v13 = vld [vmem:[%s1630_s5 + $0x60] sm:$0xff]  ;;  %v1226_v17 = vld [vmem:[%s1630_s5 + $0x58] sm:$0xff]  ;;  %v1217_v20 = vld [vmem:[%s1630_s5 + $0x10] sm:$0xff]  ;;  %p1432_p3 = scmp.ne.s32.totalorder %s1430_s16, %s1431_s19  ;;  %p1436_p11 = scmp.lt.s32.totalorder %s1430_s16, %s1751_s2 }
  0x2c   : > { %v1235_v14 = vld [vmem:[%s1630_s5 + $0xa0] sm:$0xff]  ;;  %v1234_v18 = vld [vmem:[%s1630_s5 + $0x98] sm:$0xff]  ;;  %v1225_v21 = vld [vmem:[%s1630_s5 + $0x50] sm:$0xff]  ;;  %p1437_p12 = scmp.lt.s32.totalorder %s1435_s27, %s1431_s19 }
  0x2d   : > { %v1243_v15 = vld [vmem:[%s1630_s5 + $0xe0] sm:$0xff]  ;;  %v1242_v19 = vld [vmem:[%s1630_s5 + $0xd8] sm:$0xff]  ;;  %v1233_v22 = vld [vmem:[%s1630_s5 + $0x90] sm:$0xff]  ;;  %p1433_p5 = pnand %p1432_p3, %p1573_p8 }
  0x2e   : > { %v1241_v23 = vld [vmem:[%s1630_s5 + $0xd0] sm:$0xff]  ;;  %v1216_v24 = vld [vmem:[%s1630_s5 + $0x8] sm:$0xff]  ;;  %v1215_v28 = vld [vmem:[%s1630_s5] sm:$0xff]  ;;  %p1438_p0 = por %p1437_p12, %p1436_p11 }
  0x2f   : > { %716 = vmatpush.bf16.xpose.msra.mxu0 %v1221_v4  ;;  %v1224_v25 = vld [vmem:[%s1630_s5 + $0x48] sm:$0xff]  ;;  %v1223_v29 = vld [vmem:[%s1630_s5 + $0x40] sm:$0xff]  ;;  %v1254_v32 = vld [vmem:[%s1630_s5 + $0x138] sm:$0xff]  ;;  %p1434_p7 = pneg %p1433_p5 }
  0x30   : > { %729 = vmatpush.bf16.xpose.msra.mxu1 %v1229_v5  ;;  %v1232_v26 = vld [vmem:[%s1630_s5 + $0x88] sm:$0xff]  ;;  %v1231_v30 = vld [vmem:[%s1630_s5 + $0x80] sm:$0xff]  ;;  %v1262_v33 = vld [vmem:[%s1630_s5 + $0x178] sm:$0xff] }
  0x31   : > { %742 = vmatpush.bf16.xpose.msra.mxu2 %v1237_v6  ;;  %v1240_v27 = vld [vmem:[%s1630_s5 + $0xc8] sm:$0xff]  ;;  %v1239_v31 = vld [vmem:[%s1630_s5 + $0xc0] sm:$0xff]  ;;  %v1270_v34 = vld [vmem:[%s1630_s5 + $0x1b8] sm:$0xff]  ;;  %p1439_p1 = pnand %p1438_p0, %p1434_p7 }
  0x32   : > { %755 = vmatpush.bf16.xpose.msra.mxu3 %v1245_v7  ;;  %v1278_v35 = vld [vmem:[%s1630_s5 + $0x1f8] sm:$0xff]  ;;  %v1253_v37 = vld [vmem:[%s1630_s5 + $0x130] sm:$0xff]  ;;  %v1252_v41 = vld [vmem:[%s1630_s5 + $0x128] sm:$0xff] }
  0x33   : > { %v1672_v36 = vld [vmem:[#allocation2] sm:$0xf]  ;;  %v1261_v38 = vld [vmem:[%s1630_s5 + $0x170] sm:$0xff]  ;;  %v1260_v42 = vld [vmem:[%s1630_s5 + $0x168] sm:$0xff] }
  0x34   : > { %v1269_v39 = vld [vmem:[%s1630_s5 + $0x1b0] sm:$0xff]  ;;  %v1268_v43 = vld [vmem:[%s1630_s5 + $0x1a8] sm:$0xff]  ;;  %v1251_v45 = vld [vmem:[%s1630_s5 + $0x120] sm:$0xff] }
  0x35   : > { %v1277_v40 = vld [vmem:[%s1630_s5 + $0x1f0] sm:$0xff]  ;;  %v1276_v44 = vld [vmem:[%s1630_s5 + $0x1e8] sm:$0xff]  ;;  %v1259_v46 = vld [vmem:[%s1630_s5 + $0x160] sm:$0xff] }
  0x36   : > { %v1267_v47 = vld [vmem:[%s1630_s5 + $0x1a0] sm:$0xff]  ;;  %v1250_v49 = vld [vmem:[%s1630_s5 + $0x118] sm:$0xff]  ;;  %v1249_v53 = vld [vmem:[%s1630_s5 + $0x110] sm:$0xff] }
  0x37   : > { %717 = vmatpush.bf16.xpose.msra.mxu0 %v1220_v8  ;;  %v1275_v48 = vld [vmem:[%s1630_s5 + $0x1e0] sm:$0xff]  ;;  %v1258_v50 = vld [vmem:[%s1630_s5 + $0x158] sm:$0xff]  ;;  %v1257_v54 = vld [vmem:[%s1630_s5 + $0x150] sm:$0xff] }
  0x38   : > { %730 = vmatpush.bf16.xpose.msra.mxu1 %v1228_v9  ;;  %v1266_v51 = vld [vmem:[%s1630_s5 + $0x198] sm:$0xff]  ;;  %v1265_v55 = vld [vmem:[%s1630_s5 + $0x190] sm:$0xff]  ;;  %v1248_v57 = vld [vmem:[%s1630_s5 + $0x108] sm:$0xff] }
  0x39   : > { %743 = vmatpush.bf16.xpose.msra.mxu2 %v1236_v10  ;;  %v1274_v52 = vld [vmem:[%s1630_s5 + $0x1d8] sm:$0xff]  ;;  %v1273_v56 = vld [vmem:[%s1630_s5 + $0x1d0] sm:$0xff]  ;;  %v1256_v58 = vld [vmem:[%s1630_s5 + $0x148] sm:$0xff] }
  0x3a   : > { %756 = vmatpush.bf16.xpose.msra.mxu3 %v1244_v11  ;;  %v1264_v59 = vld [vmem:[%s1630_s5 + $0x188] sm:$0xff]  ;;  %v1247_v61 = vld [vmem:[%s1630_s5 + $0x100] sm:$0xff] }
  0x3b   : > { %v1272_v60 = vld [vmem:[%s1630_s5 + $0x1c8] sm:$0xff]  ;;  %v1255_v62 = vld [vmem:[%s1630_s5 + $0x140] sm:$0xff] }
  0x3c   : > { %v1263_v63 = vld [vmem:[%s1630_s5 + $0x180] sm:$0xff] }
  0x3d   : > { %v1271_v0 = vld [vmem:[%s1630_s5 + $0x1c0] sm:$0xff] }
  0x3f   : > { %718 = vmatpush.bf16.xpose.msra.mxu0 %v1219_v12 }
  0x40   : > { %731 = vmatpush.bf16.xpose.msra.mxu1 %v1227_v13 }
  0x41   : > { %744 = vmatpush.bf16.xpose.msra.mxu2 %v1235_v14 }
  0x42   : > { %757 = vmatpush.bf16.xpose.msra.mxu3 %v1243_v15 }
  0x47   : > { %719 = vmatpush.bf16.xpose.msra.mxu0 %v1218_v16 }
  0x48   : > { %732 = vmatpush.bf16.xpose.msra.mxu1 %v1226_v17 }
  0x49   : > { %745 = vmatpush.bf16.xpose.msra.mxu2 %v1234_v18 }
  0x4a   : > { %758 = vmatpush.bf16.xpose.msra.mxu3 %v1242_v19 }
  0x4f   : > { %720 = vmatpush.bf16.xpose.msra.mxu0 %v1217_v20 }
  0x50   : > { %733 = vmatpush.bf16.xpose.msra.mxu1 %v1225_v21 }
  0x51   : > { %746 = vmatpush.bf16.xpose.msra.mxu2 %v1233_v22 }
  0x52   : > { %759 = vmatpush.bf16.xpose.msra.mxu3 %v1241_v23 }
  0x57   : > { %721 = vmatpush.bf16.xpose.msra.mxu0 %v1216_v24 }
  0x58   : > { %734 = vmatpush.bf16.xpose.msra.mxu1 %v1224_v25 }
  0x59   : > { %747 = vmatpush.bf16.xpose.msra.mxu2 %v1232_v26 }
  0x5a   : > { %760 = vmatpush.bf16.xpose.msra.mxu3 %v1240_v27 }
  0x5f   : > { %722 = vmatpush.bf16.xpose.msra.mxu0 %v1215_v28 }
  0x60   : > { %735 = vmatpush.bf16.xpose.msra.mxu1 %v1223_v29 }
  0x61   : > { %748 = vmatpush.bf16.xpose.msra.mxu2 %v1231_v30 }
  0x62   : > { %761 = vmatpush.bf16.xpose.msra.mxu3 %v1239_v31 }
  0x66   : > { %723 = vmatmul.bf16.vlgmr.msra.gmra.mxu0 %v1672_v36 }
  0x67   : > { %767 = vmatpush.bf16.xpose.msrb.mxu0 %v1254_v32  ;;  %736 = vmatmul.bf16.vlgmr.msra.gmra.mxu1 %v1672_v36 }
  0x68   : > { %780 = vmatpush.bf16.xpose.msrb.mxu1 %v1262_v33  ;;  %749 = vmatmul.bf16.vlgmr.msra.gmra.mxu2 %v1672_v36 }
  0x69   : > { %793 = vmatpush.bf16.xpose.msrb.mxu2 %v1270_v34  ;;  %762 = vmatmul.bf16.vlgmr.msra.gmra.mxu3 %v1672_v36 }
  0x6a   : > { %806 = vmatpush.bf16.xpose.msrb.mxu3 %v1278_v35 }
  0x6f   : > { %768 = vmatpush.bf16.xpose.msrb.mxu0 %v1253_v37 }
  0x70   : > { %781 = vmatpush.bf16.xpose.msrb.mxu1 %v1261_v38 }
  0x71   : > { %794 = vmatpush.bf16.xpose.msrb.mxu2 %v1269_v39 }
  0x72   : > { %807 = vmatpush.bf16.xpose.msrb.mxu3 %v1277_v40 }
  0x77   : > { %769 = vmatpush.bf16.xpose.msrb.mxu0 %v1252_v41 }
  0x78   : > { %782 = vmatpush.bf16.xpose.msrb.mxu1 %v1260_v42 }
  0x79   : > { %795 = vmatpush.bf16.xpose.msrb.mxu2 %v1268_v43 }
  0x7a   : > { %808 = vmatpush.bf16.xpose.msrb.mxu3 %v1276_v44 }
  0x7f   : > { %770 = vmatpush.bf16.xpose.msrb.mxu0 %v1251_v45 }
  0x80   : > { %783 = vmatpush.bf16.xpose.msrb.mxu1 %v1259_v46 }
  0x81   : > { %796 = vmatpush.bf16.xpose.msrb.mxu2 %v1267_v47 }
  0x82   : > { %809 = vmatpush.bf16.xpose.msrb.mxu3 %v1275_v48 }
  0x87   : > { %771 = vmatpush.bf16.xpose.msrb.mxu0 %v1250_v49 }
  0x88   : > { %784 = vmatpush.bf16.xpose.msrb.mxu1 %v1258_v50 }
  0x89   : > { %797 = vmatpush.bf16.xpose.msrb.mxu2 %v1266_v51 }
  0x8a   : > { %810 = vmatpush.bf16.xpose.msrb.mxu3 %v1274_v52 }
  0x8f   : > { %772 = vmatpush.bf16.xpose.msrb.mxu0 %v1249_v53 }
  0x90   : > { %785 = vmatpush.bf16.xpose.msrb.mxu1 %v1257_v54 }
  0x91   : > { %798 = vmatpush.bf16.xpose.msrb.mxu2 %v1265_v55 }
  0x92   : > { %811 = vmatpush.bf16.xpose.msrb.mxu3 %v1273_v56 }
  0x97   : > { %773 = vmatpush.bf16.xpose.msrb.mxu0 %v1248_v57 }
  0x98   : > { %786 = vmatpush.bf16.xpose.msrb.mxu1 %v1256_v58 }
  0x99   : > { %799 = vmatpush.bf16.xpose.msrb.mxu2 %v1264_v59 }
  0x9a   : > { %812 = vmatpush.bf16.xpose.msrb.mxu3 %v1272_v60 }
  0x9f   : > { %774 = vmatpush.bf16.xpose.msrb.mxu0 %v1247_v61 }
  0xa0   : > { %787 = vmatpush.bf16.xpose.msrb.mxu1 %v1255_v62 }
  0xa1   : > { %800 = vmatpush.bf16.xpose.msrb.mxu2 %v1263_v63 }
  0xa2   : > { %813 = vmatpush.bf16.xpose.msrb.mxu3 %v1271_v0 }
  0xa6   : > { %775 = vmatmul.bf16.vlgmr.msrb.gmra.mxu0 %v1672_v36 }
  0xa7   : > { %788 = vmatmul.bf16.vlgmr.msrb.gmra.mxu1 %v1672_v36 }
  0xa8   : > { %801 = vmatmul.bf16.vlgmr.msrb.gmra.mxu2 %v1672_v36 }
  0xa9   : > { %814 = vmatmul.bf16.vlgmr.msrb.gmra.mxu3 %v1672_v36 }
  0xe3   : > { %v724_v1 = vpop.f32.mrf.mxu0 }
  0xe4   : > { %v737_v2 = vpop.f32.mrf.mxu1  ;;  %819 = vst [vmem:[%s199_s20] sm:$0xff] %v724_v1 }
  0xe5   : > { %820 = vst [vmem:[%s199_s20 + $0x8] sm:$0xff] %v737_v2 }
  0xeb   : > { %v750_v3 = vpop.f32.mrf.mxu2  ;;  %v726_v5 = vpop.f32.mrf.mxu0 }
  0xec   : > { %v763_v4 = vpop.f32.mrf.mxu3  ;;  %821 = vst [vmem:[%s199_s20 + $0x10] sm:$0xff] %v750_v3  ;;  %v739_v6 = vpop.f32.mrf.mxu1 }
  0xed   : > { %822 = vst [vmem:[%s199_s20 + $0x18] sm:$0xff] %v763_v4 }
  0xf3   : > { %v752_v7 = vpop.f32.mrf.mxu2 }
  0xf4   : > { %v765_v8 = vpop.f32.mrf.mxu3 }
 0x123   : > { %v776_v9 = vpop.f32.mrf.mxu0 }
 0x124   : > { %v789_v10 = vpop.f32.mrf.mxu1  ;;  %823 = vst [vmem:[%s199_s20 + $0x20] sm:$0xff] %v776_v9 }
 0x125   : > { %824 = vst [vmem:[%s199_s20 + $0x28] sm:$0xff] %v789_v10 }
 0x12b   : > { %v802_v11 = vpop.f32.mrf.mxu2  ;;  %v778_v13 = vpop.f32.mrf.mxu0 }
 0x12c   : > { %v815_v12 = vpop.f32.mrf.mxu3  ;;  %825 = vst [vmem:[%s199_s20 + $0x30] sm:$0xff] %v802_v11  ;;  %v791_v14 = vpop.f32.mrf.mxu1 }
 0x12d   : > { %826 = vst [vmem:[%s199_s20 + $0x38] sm:$0xff] %v815_v12 }
 0x12e   : > { %1442 = shalt.err (!%p1439_p1)
}
 0x12f   : > { %1286 = dma.vmem_to_hbm [thread:$0]  (%p1573_p8), %s844_s8, 1024, %s846_s15, %s828_s12  }
 0x133   : > { %v804_v15 = vpop.f32.mrf.mxu2 }
 0x134   : > { %v817_v16 = vpop.f32.mrf.mxu3 }
 0x135 PF: > { %s857_s17 = sand.u32 1, %s1481_s9   ;;  %p1297_p2 = pnand %p945_p13, %p1577_p9 }
 0x136   : > { %s858_s4 = scalar_lea.sflag [#allocation4], %s857_s17 }
 0x137   : > { %p1298_p4 = pneg %p1297_p2 }
 0x139   : > { %1476 = dma.done.wait (%p1298_p4), %s858_s4, 1024  }
 0x13a   : > { %1478 = vsyncadd (%p1298_p4), %s858_s4, 4294966272  ;;  %s19_s14 = sadd.s32 1, %s1501_s14   ;;  %s1759_s9 = smov %s1485_s10 }
 0x13b   : > { %p16_p6 = scmp.ge.s32.totalorder %s19_s14, 4   ;;  %s1760_s10 = smov %s1489_s11 }
 0x13c   : > { %s1761_s11 = smov %s1615_s23  ;;  %s1762_s12 = smov %s1497_s13 }
 0x13d   : > { %s1763_s13 = smov %s1765_s30  ;;  %18 = sbr.rel (!%p16_p6) target bundleno = 7 (0x7), region = 79 }
 0x142   :  { %864 = vsyncpa [#allocation3], 1 }
 0x143   :  { %866 = vsyncpa [#allocation3 + $0x1], 1 }
 0x144   :  { %867 = vsyncpa [#allocation6], 1 }
 0x145   :  { %869 = vsyncpa [#allocation6 + $0x1], 1 }
 0x146   :  { %870 = vsyncpa [#allocation4], 1 }
 0x147   :  { %872 = vsyncpa [#allocation4 + $0x1], 1 }

</bundles_post_ra>
